<compile_context>
chip_gen: v7x
topology: tpu7x:2x2x1
jax: 0.10.0
libtpu: 0.0.40
codegen_flags: <defaults>
</compile_context>

<pallas_src>
import jax
import jax.numpy as jnp
from jax.experimental import pallas as pl
from jax.experimental.pallas import tpu as pltpu


# ----------------------------------------------------------------------------- utils

def _round_up(x, m):
    return ((x + m - 1) // m) * m


def _vmem_capacity_bytes():
    """Per-TensorCore VMEM capacity; conservative fallback if the query is unavailable."""
    try:
        return int(pltpu.get_tpu_info().vmem_capacity_bytes)
    except Exception:
        return 64 << 20  # v7x per-TC capacity = most conservative


def _resident_vmem_bytes(tb, Dp, D2p, itemsize):
    # Honest worst case: assume the two resident weight planes are double-buffered even
    # though we request pl.Buffered(1) (constant index_map -> one buffer suffices).
    w = 2 * 2 * D2p * D2p * itemsize
    act = 2 * 2 * tb * Dp * itemsize          # xr, xi tiles, double-buffered
    outb = 2 * tb * D2p * 4                   # f32 output tile, double-buffered
    interm = 2 * tb * D2p * 4                 # y + layer-1 partials (compiler VMEM scratch)
    return w + act + outb + interm


def _ktiled_vmem_bytes(tb, Dp, D2p, tk, itemsize):
    w = 2 * 2 * D2p * tk * itemsize           # w1/w2 chunks, double-buffered
    act = 2 * 2 * tb * Dp * itemsize
    outb = 2 * tb * D2p * 4
    acc = tb * D2p * 4                        # VMEM accumulator scratch
    interm = 2 * tb * tk * 4                  # y chunk + partials
    return w + act + outb + acc + interm


def _vmem_limit(est_bytes, budget_cap):
    if est_bytes <= (12 << 20):
        return None                            # fits every generation's default scoped VMEM
    return min(max(int(est_bytes * 1.5), 32 << 20), budget_cap)


def _pick_batch_tiling(B, block_b):
    """Pad batch and pick a tile so the grid has >= 2 steps (pipelining / v7x 2 TCs).
    Granule 16 keeps bf16 sublane tiling clean as well as f32."""
    Bp = max(_round_up(B, 16), 32)
    tb = min(block_b, Bp)
    if Bp // tb < 2:
        tb = max(16, _round_up(-(-Bp // 2), 16))
    Bp = _round_up(Bp, tb)
    return Bp, tb


# ----------------------------------------------------------------------------- kernels

def _make_resident_kernel(Dp):
    def kernel(xr_ref, xi_ref, w1_ref, w2_ref, o_ref):
        # Layer 1: [xr|xi] @ Wblk computed as a row-block split (no concat needed).
        y = jnp.maximum(
            jnp.dot(xr_ref[...], w1_ref[:Dp, :], preferred_element_type=jnp.float32)
            + jnp.dot(xi_ref[...], w1_ref[Dp:, :], preferred_element_type=jnp.float32),
            0.0)
        # Layer 2 on the packed [Re|Im] slab; ReLU per part == ReLU on the packed slab.
        z = jnp.maximum(
            jnp.dot(y.astype(w2_ref.dtype), w2_ref[...],
                    preferred_element_type=jnp.float32),
            0.0)
        o_ref[...] = z.astype(o_ref.dtype)
    return kernel


def _make_ktiled_kernel(Dp):
    def kernel(xr_ref, xi_ref, w1_ref, w2_ref, o_ref, acc_ref):
        k = pl.program_id(1)

        @pl.when(k == 0)
        def _():
            acc_ref[...] = jnp.zeros_like(acc_ref)

        # y chunk for columns [k*tk, (k+1)*tk) of layer 1; ReLU is element/column-wise
        # so it can be applied per chunk before the partial layer-2 dot.
        y = jnp.maximum(
            jnp.dot(xr_ref[...], w1_ref[:Dp, :], preferred_element_type=jnp.float32)
            + jnp.dot(xi_ref[...], w1_ref[Dp:, :], preferred_element_type=jnp.float32),
            0.0)
        acc_ref[...] += jnp.dot(y.astype(w2_ref.dtype), w2_ref[...],
                                preferred_element_type=jnp.float32)

        @pl.when(k == pl.num_programs(1) - 1)
        def _():
            o_ref[...] = jnp.maximum(acc_ref[...], 0.0).astype(o_ref.dtype)
    return kernel


# ----------------------------------------------------------------------------- wrappers

def pack_weight(w_complex, compute_dtype=jnp.float32):
    """(D, D) complex -> (2*Dp, 2*Dp) real block matrix with Dp = round_up(D, 64), so the
    packed width is a multiple of 128 (lane-dense). Satisfies
      [xr|0|xi|0] @ Wblk == [Re(x @ w^T)|0|Im(x @ w^T)|0].
    Call ONCE at model init (per-call packing adds XLA transpose/concat work that can
    rival the kernel in the small-D regime)."""
    D = w_complex.shape[0]
    Dp = _round_up(D, 64)
    wr = jnp.real(w_complex).astype(jnp.float32)
    wi = jnp.imag(w_complex).astype(jnp.float32)
    pad = lambda a: jnp.pad(a, ((0, Dp - D), (0, Dp - D)))
    wrt, wit = pad(wr.T), pad(wi.T)
    top = jnp.concatenate([wrt, wit], axis=1)
    bot = jnp.concatenate([-wit, wrt], axis=1)
    return jnp.concatenate([top, bot], axis=0).astype(compute_dtype)


def inverse_approx_packed(x_complex, w1_packed, w2_packed, n_streams, *,
                          block_b=128, force_k_tiled=False, tk=None):
    """x_complex: (B, N_S, N_S) complex64; w*_packed: (2*Dp, 2*Dp) from pack_weight.
    Compute dtype (f32 exact / bf16 fast) is inferred from the packed weight dtype."""
    B = x_complex.shape[0]
    D = n_streams * n_streams
    Dp = _round_up(D, 64)
    D2p = 2 * Dp
    assert w1_packed.shape == (D2p, D2p) and w2_packed.shape == (D2p, D2p)
    compute_dtype = w1_packed.dtype
    itemsize = jnp.dtype(compute_dtype).itemsize

    # ---- static tiling / memory decisions -------------------------------------------
    Bp, tb = _pick_batch_tiling(B, block_b)
    budget_cap = int(_vmem_capacity_bytes() * 0.8)   # headroom for Mosaic internal scratch

    resident_bytes = _resident_vmem_bytes(tb, Dp, D2p, itemsize)
    use_ktiled = force_k_tiled or resident_bytes > budget_cap

    if use_ktiled:
        if tk is None:
            cands = [c for c in (512, 384, 256, 128) if c <= D2p and D2p % c == 0] or [128]
            tk = next((c for c in cands
                       if _ktiled_vmem_bytes(tb, Dp, D2p, c, itemsize) <= budget_cap),
                      cands[-1])
        assert D2p % tk == 0, "tk must divide the packed width 2*Dp"
        # If still tight, halve the batch tile rather than the weight scheme (review).
        while _ktiled_vmem_bytes(tb, Dp, D2p, tk, itemsize) > budget_cap and tb > 16:
            tb = max(16, _round_up(tb // 2, 16))
        Bp = _round_up(max(Bp, 2 * tb), tb)
        est = _ktiled_vmem_bytes(tb, Dp, D2p, tk, itemsize)
    else:
        est = resident_bytes

    vmem_limit = _vmem_limit(est, budget_cap)
    grid_b = Bp // tb

    # ---- activations: split real/imag, pad batch & feature dims (fuses into the
    # extraction in XLA; no separate (B, 2D) concatenate HBM pass) ----------------------
    pad_cfg = ((0, Bp - B), (0, Dp - D))
    xr = jnp.pad(jnp.real(x_complex).reshape(B, D), pad_cfg).astype(compute_dtype)
    xi = jnp.pad(jnp.imag(x_complex).reshape(B, D), pad_cfg).astype(compute_dtype)

    if not use_ktiled:
        def _resident(single_buffered_weights):
            if single_buffered_weights:
                w_spec = pl.BlockSpec((D2p, D2p), lambda i: (0, 0),
                                      pipeline_mode=pl.Buffered(1))
            else:
                w_spec = pl.BlockSpec((D2p, D2p), lambda i: (0, 0))
            return pl.pallas_call(
                _make_resident_kernel(Dp),
                out_shape=jax.ShapeDtypeStruct((Bp, D2p), jnp.float32),
                grid=(grid_b,),
                in_specs=[
                    pl.BlockSpec((tb, Dp), lambda i: (i, 0)),   # xr tile
                    pl.BlockSpec((tb, Dp), lambda i: (i, 0)),   # xi tile
                    w_spec,                                     # W1 block: resident
                    w_spec,                                     # W2 block: resident
                ],
                out_specs=pl.BlockSpec((tb, D2p), lambda i: (i, 0)),
                compiler_params=pltpu.CompilerParams(
                    # "parallel" lets v7x shard the >=2 batch steps across its 2 TCs
                    # (pltpu.CORE_PARALLEL is a further option there).
                    dimension_semantics=("parallel",),
                    vmem_limit_bytes=vmem_limit),
            )(xr, xi, w1_packed, w2_packed)

        try:
            out = _resident(single_buffered_weights=True)
        except Exception:
            # TODO(synk): pl.Buffered(1) rejected by this jax/Mosaic version; fall back to
            # default double-buffered weights (the VMEM budget already assumes 2x).
            out = _resident(single_buffered_weights=False)
    else:
        grid_k = D2p // tk
        out = pl.pallas_call(
            _make_ktiled_kernel(Dp),
            out_shape=jax.ShapeDtypeStruct((Bp, D2p), jnp.float32),
            grid=(grid_b, grid_k),                              # reduction axis last
            in_specs=[
                pl.BlockSpec((tb, Dp), lambda i, k: (i, 0)),    # xr: resident across k
                pl.BlockSpec((tb, Dp), lambda i, k: (i, 0)),    # xi: resident across k
                pl.BlockSpec((D2p, tk), lambda i, k: (0, k)),   # W1 column chunk
                pl.BlockSpec((tk, D2p), lambda i, k: (k, 0)),   # W2 row chunk
            ],
            out_specs=pl.BlockSpec((tb, D2p), lambda i, k: (i, 0)),
            scratch_shapes=[pltpu.VMEM((tb, D2p), jnp.float32)],
            compiler_params=pltpu.CompilerParams(
                dimension_semantics=("parallel", "arbitrary"),
                vmem_limit_bytes=vmem_limit),
        )(xr, xi, w1_packed, w2_packed)

    zr = out[:B, :D]
    zi = out[:B, Dp:Dp + D]
    return (zr + 1j * zi).astype(jnp.complex64).reshape(B, n_streams, n_streams)


def inverse_approx(x_complex, w1_complex, w2_complex, n_streams, *,
                   compute_dtype=jnp.float32, **kwargs):
    """Convenience wrapper taking raw complex weights. compute_dtype=jnp.bfloat16 is the
    recommended performance configuration; float32 reproduces the module exactly."""
    return inverse_approx_packed(
        x_complex,
        pack_weight(w1_complex, compute_dtype),
        pack_weight(w2_complex, compute_dtype),
        n_streams, **kwargs)


def _reference(x_complex, w1_complex, w2_complex, n_streams):
    """Pure-JAX reference matching the PyTorch forward (fp32 complex)."""
    B = x_complex.shape[0]

    def relu_parts(c):
        return (jnp.maximum(jnp.real(c), 0.0)
                + 1j * jnp.maximum(jnp.imag(c), 0.0)).astype(jnp.complex64)

    y = relu_parts(jnp.matmul(x_complex.reshape(B, -1), w1_complex.T))
    z = relu_parts(jnp.matmul(y, w2_complex.T))
    return z.reshape(B, n_streams, n_streams)


# ----------------------------------------------------------------------------- demo

if __name__ == "__main__":
    def make_inputs(key, B, N_S):
        D = N_S * N_S
        ks = jax.random.split(key, 6)
        cplx = lambda kr, ki, shape: (
            jax.random.normal(kr, shape, jnp.float32)
            + 1j * jax.random.normal(ki, shape, jnp.float32)).astype(jnp.complex64)
        return (cplx(ks[0], ks[1], (B, N_S, N_S)),
                cplx(ks[2], ks[3], (D, D)),
                cplx(ks[4], ks[5], (D, D)))

    def rel_err(a, b):
        num = jnp.sqrt(jnp.sum(jnp.abs(a - b) ** 2))
        den = jnp.sqrt(jnp.sum(jnp.abs(b) ** 2))
        return float(num / den)

    root = jax.random.PRNGKey(0)
    k_small, k_big = jax.random.split(root)

    # 1) Exact-precision (f32) resident-weight path vs complex reference.
    N_S, B = 4, 2
    x, w1, w2 = make_inputs(k_small, B, N_S)
    ref = _reference(x, w1, w2, N_S)
    out_f32 = jax.block_until_ready(
        inverse_approx(x, w1, w2, N_S, compute_dtype=jnp.float32))
    assert out_f32.shape == (B, N_S, N_S) and out_f32.dtype == jnp.complex64
    assert jnp.allclose(out_f32, ref, atol=1e-4, rtol=1e-4), "f32 path mismatch vs reference"

    # 2) bf16 MXU path (recommended perf config): same math at bf16 input precision.
    out_bf16 = jax.block_until_ready(
        inverse_approx(x, w1, w2, N_S, compute_dtype=jnp.bfloat16))
    assert rel_err(out_bf16, ref) < 5e-2, "bf16 path error too large"

    # 3) K-tiled fallback (large-D / tight-VMEM path), forced at small size (3 k-steps).
    N_S2, B2 = 12, 4
    x2, w12, w22 = make_inputs(k_big, B2, N_S2)
    ref2 = _reference(x2, w12, w22, N_S2)
    out_kt = jax.block_until_ready(
        inverse_approx(x2, w12, w22, N_S2, compute_dtype=jnp.float32,
                       force_k_tiled=True, tk=128))
    assert out_kt.shape == (B2, N_S2, N_S2)
    assert rel_err(out_kt, ref2) < 1e-2, "k-tiled path mismatch vs reference"

    print("KERNEL_OK")
</pallas_src>

<mosaic_0001>
module attributes {stable_mosaic.version = 11 : i64} {
  func.func @kernel(%arg0: i32, %arg1: memref<16x64xf32, #tpu.memory_space<vmem>>, %arg2: memref<16x64xf32, #tpu.memory_space<vmem>>, %arg3: memref<128x128xf32, #tpu.memory_space<vmem>>, %arg4: memref<128x128xf32, #tpu.memory_space<vmem>>, %arg5: memref<16x128xf32, #tpu.memory_space<vmem>>) attributes {dimension_semantics = [#tpu.dimension_semantics<parallel>], iteration_bounds = array<i64: 2>, scalar_prefetch = 0 : i64, scratch_operands = 0 : i64, tpu.core_type = #tpu.core_type<tc>, window_params = [{transform_indices = @transform_0, window_bounds = array<i64: 16, 64>}, {transform_indices = @transform_1, window_bounds = array<i64: 16, 64>}, {pipeline_mode = #tpu.pipeline_mode<synchronous>, transform_indices = @transform_2, window_bounds = array<i64: 128, 128>}, {pipeline_mode = #tpu.pipeline_mode<synchronous>, transform_indices = @transform_3, window_bounds = array<i64: 128, 128>}, {transform_indices = @transform_4, window_bounds = array<i64: 16, 128>}]} {
    %c0 = arith.constant 0 : index
    %c0_0 = arith.constant 0 : index
    %0 = vector.load %arg1[%c0, %c0_0] : memref<16x64xf32, #tpu.memory_space<vmem>>, vector<16x64xf32>
    %c0_1 = arith.constant 0 : index
    %c0_2 = arith.constant 0 : index
    %1 = vector.load %arg3[%c0_1, %c0_2] : memref<128x128xf32, #tpu.memory_space<vmem>>, vector<64x128xf32>
    %cst = arith.constant dense<0.000000e+00> : vector<16x128xf32>
    %2 = tpu.matmul %0, %1, %cst {dimension_numbers = #tpu.dot_dimension_numbers<[1], [0], [0], [1], [0, 0, 1, 1], [], []>} : vector<16x64xf32>, vector<64x128xf32>, vector<16x128xf32> -> vector<16x128xf32>
    %c0_3 = arith.constant 0 : index
    %c0_4 = arith.constant 0 : index
    %3 = vector.load %arg2[%c0_3, %c0_4] : memref<16x64xf32, #tpu.memory_space<vmem>>, vector<16x64xf32>
    %c64 = arith.constant 64 : index
    %c0_5 = arith.constant 0 : index
    %4 = vector.load %arg3[%c64, %c0_5] : memref<128x128xf32, #tpu.memory_space<vmem>>, vector<64x128xf32>
    %cst_6 = arith.constant dense<0.000000e+00> : vector<16x128xf32>
    %5 = tpu.matmul %3, %4, %cst_6 {dimension_numbers = #tpu.dot_dimension_numbers<[1], [0], [0], [1], [0, 0, 1, 1], [], []>} : vector<16x64xf32>, vector<64x128xf32>, vector<16x128xf32> -> vector<16x128xf32>
    %6 = arith.addf %2, %5 : vector<16x128xf32>
    %cst_7 = arith.constant 0.000000e+00 : f32
    %7 = vector.broadcast %cst_7 : f32 to vector<16x128xf32>
    %8 = arith.maximumf %6, %7 : vector<16x128xf32>
    %c0_8 = arith.constant 0 : index
    %c0_9 = arith.constant 0 : index
    %9 = vector.load %arg4[%c0_8, %c0_9] : memref<128x128xf32, #tpu.memory_space<vmem>>, vector<128x128xf32>
    %cst_10 = arith.constant dense<0.000000e+00> : vector<16x128xf32>
    %10 = tpu.matmul %8, %9, %cst_10 {dimension_numbers = #tpu.dot_dimension_numbers<[1], [0], [0], [1], [0, 0, 1, 1], [], []>} : vector<16x128xf32>, vector<128x128xf32>, vector<16x128xf32> -> vector<16x128xf32>
    %cst_11 = arith.constant 0.000000e+00 : f32
    %11 = vector.broadcast %cst_11 : f32 to vector<16x128xf32>
    %12 = arith.maximumf %10, %11 : vector<16x128xf32>
    %c0_12 = arith.constant 0 : index
    %c0_13 = arith.constant 0 : index
    %13 = vector.load %arg5[%c0_12, %c0_13] : memref<16x128xf32, #tpu.memory_space<vmem>>, vector<16x128xf32>
    tpu.vector_store %arg5[%c0_12, %c0_13], %12 {strides = array<i32>} : memref<16x128xf32, #tpu.memory_space<vmem>>, vector<16x128xf32>,
    return
  }
  func.func @transform_0(%arg0: i32) -> (i32, i32) {
    %c0_i32 = arith.constant 0 : i32
    %c0_i32_0 = arith.constant 0 : i32
    return %arg0, %c0_i32 : i32, i32
  }
  func.func @transform_1(%arg0: i32) -> (i32, i32) {
    %c0_i32 = arith.constant 0 : i32
    %c0_i32_0 = arith.constant 0 : i32
    return %arg0, %c0_i32 : i32, i32
  }
  func.func @transform_2(%arg0: i32) -> (i32, i32) {
    %c0_i32 = arith.constant 0 : i32
    %c0_i32_0 = arith.constant 0 : i32
    %c0_i32_1 = arith.constant 0 : i32
    return %c0_i32, %c0_i32_0 : i32, i32
  }
  func.func @transform_3(%arg0: i32) -> (i32, i32) {
    %c0_i32 = arith.constant 0 : i32
    %c0_i32_0 = arith.constant 0 : i32
    %c0_i32_1 = arith.constant 0 : i32
    return %c0_i32, %c0_i32_0 : i32, i32
  }
  func.func @transform_4(%arg0: i32) -> (i32, i32) {
    %c0_i32 = arith.constant 0 : i32
    %c0_i32_0 = arith.constant 0 : i32
    return %arg0, %c0_i32 : i32, i32
  }
}

module attributes {stable_mosaic.version = 11 : i64} {
  func.func @kernel(%arg0: i32, %arg1: memref<16x64xf32, #tpu.memory_space<vmem>>, %arg2: memref<16x64xf32, #tpu.memory_space<vmem>>, %arg3: memref<128x128xf32, #tpu.memory_space<vmem>>, %arg4: memref<128x128xf32, #tpu.memory_space<vmem>>, %arg5: memref<16x128xf32, #tpu.memory_space<vmem>>) attributes {dimension_semantics = [#tpu.dimension_semantics<parallel>], iteration_bounds = array<i64: 2>, scalar_prefetch = 0 : i64, scratch_operands = 0 : i64, tpu.core_type = #tpu.core_type<tc>, window_params = [{transform_indices = @transform_0, window_bounds = array<i64: 16, 64>}, {transform_indices = @transform_1, window_bounds = array<i64: 16, 64>}, {pipeline_mode = #tpu.pipeline_mode<synchronous>, transform_indices = @transform_2, window_bounds = array<i64: 128, 128>}, {pipeline_mode = #tpu.pipeline_mode<synchronous>, transform_indices = @transform_3, window_bounds = array<i64: 128, 128>}, {transform_indices = @transform_4, window_bounds = array<i64: 16, 128>}]} {
    %c0 = arith.constant 0 : index
    %c0_0 = arith.constant 0 : index
    %0 = vector.load %arg1[%c0, %c0_0] : memref<16x64xf32, #tpu.memory_space<vmem>>, vector<16x64xf32>
    %c0_1 = arith.constant 0 : index
    %c0_2 = arith.constant 0 : index
    %1 = vector.load %arg3[%c0_1, %c0_2] : memref<128x128xf32, #tpu.memory_space<vmem>>, vector<64x128xf32>
    %cst = arith.constant dense<0.000000e+00> : vector<16x128xf32>
    %2 = tpu.matmul %0, %1, %cst {dimension_numbers = #tpu.dot_dimension_numbers<[1], [0], [0], [1], [0, 0, 1, 1], [], []>} : vector<16x64xf32>, vector<64x128xf32>, vector<16x128xf32> -> vector<16x128xf32>
    %c0_3 = arith.constant 0 : index
    %c0_4 = arith.constant 0 : index
    %3 = vector.load %arg2[%c0_3, %c0_4] : memref<16x64xf32, #tpu.memory_space<vmem>>, vector<16x64xf32>
    %c64 = arith.constant 64 : index
    %c0_5 = arith.constant 0 : index
    %4 = vector.load %arg3[%c64, %c0_5] : memref<128x128xf32, #tpu.memory_space<vmem>>, vector<64x128xf32>
    %cst_6 = arith.constant dense<0.000000e+00> : vector<16x128xf32>
    %5 = tpu.matmul %3, %4, %cst_6 {dimension_numbers = #tpu.dot_dimension_numbers<[1], [0], [0], [1], [0, 0, 1, 1], [], []>} : vector<16x64xf32>, vector<64x128xf32>, vector<16x128xf32> -> vector<16x128xf32>
    %6 = arith.addf %2, %5 : vector<16x128xf32>
    %cst_7 = arith.constant 0.000000e+00 : f32
    %7 = vector.broadcast %cst_7 : f32 to vector<16x128xf32>
    %8 = arith.maximumf %6, %7 : vector<16x128xf32>
    %c0_8 = arith.constant 0 : index
    %c0_9 = arith.constant 0 : index
    %9 = vector.load %arg4[%c0_8, %c0_9] : memref<128x128xf32, #tpu.memory_space<vmem>>, vector<128x128xf32>
    %cst_10 = arith.constant dense<0.000000e+00> : vector<16x128xf32>
    %10 = tpu.matmul %8, %9, %cst_10 {dimension_numbers = #tpu.dot_dimension_numbers<[1], [0], [0], [1], [0, 0, 1, 1], [], []>} : vector<16x128xf32>, vector<128x128xf32>, vector<16x128xf32> -> vector<16x128xf32>
    %cst_11 = arith.constant 0.000000e+00 : f32
    %11 = vector.broadcast %cst_11 : f32 to vector<16x128xf32>
    %12 = arith.maximumf %10, %11 : vector<16x128xf32>
    %c0_12 = arith.constant 0 : index
    %c0_13 = arith.constant 0 : index
    %13 = vector.load %arg5[%c0_12, %c0_13] : memref<16x128xf32, #tpu.memory_space<vmem>>, vector<16x128xf32>
    tpu.vector_store %arg5[%c0_12, %c0_13], %12 {strides = array<i32>} : memref<16x128xf32, #tpu.memory_space<vmem>>, vector<16x128xf32>,
    return
  }
  func.func @transform_0(%arg0: i32) -> (i32, i32) {
    %c0_i32 = arith.constant 0 : i32
    %c0_i32_0 = arith.constant 0 : i32
    return %arg0, %c0_i32 : i32, i32
  }
  func.func @transform_1(%arg0: i32) -> (i32, i32) {
    %c0_i32 = arith.constant 0 : i32
    %c0_i32_0 = arith.constant 0 : i32
    return %arg0, %c0_i32 : i32, i32
  }
  func.func @transform_2(%arg0: i32) -> (i32, i32) {
    %c0_i32 = arith.constant 0 : i32
    %c0_i32_0 = arith.constant 0 : i32
    %c0_i32_1 = arith.constant 0 : i32
    return %c0_i32, %c0_i32_0 : i32, i32
  }
  func.func @transform_3(%arg0: i32) -> (i32, i32) {
    %c0_i32 = arith.constant 0 : i32
    %c0_i32_0 = arith.constant 0 : i32
    %c0_i32_1 = arith.constant 0 : i32
    return %c0_i32, %c0_i32_0 : i32, i32
  }
  func.func @transform_4(%arg0: i32) -> (i32, i32) {
    %c0_i32 = arith.constant 0 : i32
    %c0_i32_0 = arith.constant 0 : i32
    return %arg0, %c0_i32 : i32, i32
  }
}

</mosaic_0001>

<bundles_post_ra>
// kernel: tpu_custom_call.1
= control target key start
LH: loop header
LB: loop body
LE: loop exit
PB: predicated region body
PF: predicated region fallthrough
CT: control target
= control target key end

     0   :  { %s1518_s0 = inlined_call_operand.hbm [shape: f32[32,64], index: 0, kind: input, shape index: {}]   ;;  %s1519_s1 = inlined_call_operand.hbm [shape: f32[32,64], index: 1, kind: input, shape index: {}]   ;;  %s1520_s2 = inlined_call_operand.hbm [shape: f32[128,128], index: 2, kind: input, shape index: {}]   ;;  %s1521_s3 = inlined_call_operand.hbm [shape: f32[128,128], index: 3, kind: input, shape index: {}]   ;;  %s1522_s4 = inlined_call_operand.hbm [shape: f32[32,128], index: 4, kind: output, shape index: {}]  }
   0x1   :  { %1530 = sst [smem:[#allocation16_spill]] %s1518_s0 }
   0x2   :  { %9 = vsyncpa [#allocation3], 0 }
   0x3   :  { %11 = vsyncpa [#allocation3 + $0x1], 0 }
   0x4   :  { %12 = vsyncpa [#allocation6], 0 }
   0x5   :  { %14 = vsyncpa [#allocation6 + $0x1], 0 }
   0x6   :  { %15 = vsyncpa [#allocation9], 0 }
   0x7   :  { %16 = vsyncpa [#allocation4], 0 }
   0x8   :  { %18 = vsyncpa [#allocation4 + $0x1], 0  ;;  %s1209_s15 = smov 0   ;;  %s1211_s16 = smov 0  }
   0x9   :  { %s1213_s17 = smov 0   ;;  %s1215_s18 = smov 0  }
   0xa LB: > { %s1230_s19 = sadd.s32 4294967295, %s1173_s18   ;;  %s697_s20 = sadd.s32 4294967294, %s1173_s18   ;;  %s1173_s18 = sphi %s1215_s18, %s1552_s18   ;;  %s1169_s17 = sphi %s1213_s17, %s1551_s17   ;;  %s1165_s16 = sphi %s1211_s16, %s1550_s16   ;;  %s1161_s15 = sphi %s1209_s15, %s1549_s15  }
   0xb   : > { %p44_p0 = scmp.ne.s32.totalorder %s1165_s16, %s1161_s15  ;;  %p1523_p1 = scmp.eq.s32.totalorder %s1230_s19, 0 }
   0xc   : > { %p142_p3 = scmp.eq.s32.totalorder %s697_s20, 1  ;;  %p698_p5 = scmp.ge.s32.totalorder %s1173_s18, 1 }
   0xd   : > { %p1239_p4 = por %p1523_p1, %p44_p0  ;;  %p149_p7 = scmp.lt.s32.totalorder %s1173_s18, 3 }
   0xe   : > { %p1244_p6 = por %p142_p3, %p44_p0  ;;  %s1175_s24 = smov [#allocation7]  }
   0xf   : > { %s1531_s21 = scalar_select %p1239_p4, 1, 0 }
  0x10   : > { %s1532_s22 = scalar_select %p1244_p6, 1, 0 }
  0x11   : > { %p1249_p8 = pnand %p698_p5, %p149_p7  ;;  %s161_s25 = sshll.u32 %s1175_s24, 4  ;;  %s1253_s25 = int_to_ptr.vmem [resolvable:$true] %s161_s25 }
  0x12   : > { %s1176_s27 = smov [#allocation8]   ;;  %s979_s5 = scalar_lea.hbm %s1520_s2, 2048 }
  0x13   : > { %p917_p9 = pneg %p1249_p8  ;;  %s174_s28 = sshll.u32 %s1176_s27, 4  ;;  %s1264_s28 = int_to_ptr.vmem [resolvable:$true] %s174_s28 }
  0x14   : > { %p980_p12 = scmp.ne.s32.totalorder %s1520_s2, %s979_s5  ;;  %p986_p5 = scmp.lt.u32.totalorder %s979_s5, %s1520_s2 }
  0x15   : > { %p1260_p11 = pnand %p917_p9, %p1523_p1 }
  0x17   : > { %p981_p13 = pneg %p1260_p11 }
  0x19   : > { %p982_p0 = pnand %p981_p13, %p980_p12 }
  0x1b   : > { %p983_p3 = pneg %p982_p0 }
  0x1d   : > { %p988_p7 = pnand %p986_p5, %p983_p3 }
  0x1f   : > { %991 = shalt.err (!%p988_p7)
}
  0x20   : > { %s992_s10 = scalar_lea.vmem %s1253_s25, 2048  ;;  %p1000_p2 = scmp.lt.s32.totalorder %s1253_s25, %s1253_s25 }
  0x21   : > { %p993_p9 = scmp.ne.s32.totalorder %s1253_s25, %s992_s10  ;;  %p1001_p12 = scmp.lt.s32.totalorder %s992_s10, %s992_s10 }
  0x23   : > { %p995_p10 = pnand %p993_p9, %p981_p13  ;;  %p1002_p0 = por %p1001_p12, %p1000_p2 }
  0x25   : > { %p996_p1 = pneg %p995_p10 }
  0x27   : > { %p1003_p6 = pnand %p1002_p0, %p996_p1 }
  0x29   : > { %1006 = shalt.err (!%p1003_p6)
}
  0x2a   : > { %s1524_s11 = smov 128   ;;  %s1526_s12 = smov 8  }
  0x2b   : > { %920 = dma.hbm_to_vmem [thread:$0]  (!%p1260_p11), %s1520_s2, 2048, %s1253_s25, [#allocation6], %s1524_s11, %s1524_s11, %s1526_s12  }
  0x2c   : > { %s1007_s27 = scalar_lea.hbm %s1521_s3, 2048 }
  0x2d   : > { %p1008_p1 = scmp.ne.s32.totalorder %s1521_s3, %s1007_s27  ;;  %p1014_p10 = scmp.lt.u32.totalorder %s1007_s27, %s1521_s3 }
  0x2f   : > { %p1010_p2 = pnand %p1008_p1, %p981_p13 }
  0x31   : > { %p1011_p6 = pneg %p1010_p2 }
  0x33   : > { %p1016_p3 = pnand %p1014_p10, %p1011_p6 }
  0x35   : > { %1019 = shalt.err (!%p1016_p3)
}
  0x36   : > { %s1020_s25 = scalar_lea.vmem %s1264_s28, 2048  ;;  %p1028_p12 = scmp.lt.s32.totalorder %s1264_s28, %s1264_s28 }
  0x37   : > { %p1021_p5 = scmp.ne.s32.totalorder %s1264_s28, %s1020_s25  ;;  %p1029_p0 = scmp.lt.s32.totalorder %s1020_s25, %s1020_s25 }
  0x39   : > { %p1023_p7 = pnand %p1021_p5, %p981_p13  ;;  %p1030_p1 = por %p1029_p0, %p1028_p12 }
  0x3b   : > { %p1024_p9 = pneg %p1023_p7 }
  0x3d   : > { %p1031_p2 = pnand %p1030_p1, %p1024_p9 }
  0x3f   : > { %1034 = shalt.err (!%p1031_p2)
}
  0x40   : > { %923 = dma.hbm_to_vmem [thread:$0]  (!%p1260_p11), %s1521_s3, 2048, %s1264_s28, [#allocation9], %s1524_s11, %s1524_s11, %s1526_s12  }
  0x41   : > { %s1325_s26 = sadd.s32 1, %s1173_s18   ;;  %s31_s9 = sadd.s32 1, %s1169_s17 }
  0x42   : > { %s28_s10 = ssub.s32 %s1173_s18, %s1325_s26  ;;  %p38_p13 = scmp.ne.s32.totalorder %s1169_s17, %s1165_s16 }
  0x43   : > { %p29_p6 = scmp.eq.s32.totalorder %s28_s10, 0  ;;  %p39_p10 = scmp.eq.s32.totalorder %s1173_s18, 0 }
  0x44   : > { %p1535_p3 = scmp.eq.s32.totalorder %s1230_s19, 1  ;;  %p937_p7 = scmp.lt.s32.totalorder %s1173_s18, 2 }
  0x45   : > { %s1341_s14 = scalar_select %p29_p6, %s1169_s17, %s31_s9  }
  0x46   : > { %p1335_p5 = por %p1535_p3, %p38_p13  ;;  %p40_p9 = por %p39_p10, %p38_p13 }
  0x47   : > { %s188_s20 = sand.u32 1, %s1169_s17   ;;  %s723_s28 = sshll.u32 %s1173_s18, 8 }
  0x48   : > { %s1536_s13 = scalar_select %p1335_p5, 1, 0 }
  0x49   : > { %s702_s24 = sshll.u32 %s188_s20, 4  ;;  %s1537_s0 = sld [smem:[#allocation16_spill]] }
  0x4a   : > { %s192_s5 = scalar_lea.vmem [#allocation2], %s702_s24  ;;  %p1352_p11 = pnand %p937_p7, %p40_p9 }
  0x4b   : > { %s199_s6 = sshll.u32 %s192_s5, 4  ;;  %s1359_s9 = scalar_lea.hbm %s1519_s1, %s723_s28  ;;  %s1350_s6 = int_to_ptr.vmem [resolvable:$true] %s199_s6 }
  0x4c   : > { %s213_s10 = scalar_lea.vmem [#allocation5], %s702_s24  ;;  %s1363_s29 = scalar_lea.sflag [#allocation3], %s188_s20 }
  0x4d   : > { %s1361_s27 = sshll.u32 %s213_s10, 4  ;;  %p1037_p0 = pneg %p1352_p11  ;;  %s1395_s27 = int_to_ptr.vmem [resolvable:$true] %s1361_s27 }
  0x4f   : > { %s1348_s30 = scalar_lea.hbm %s1537_s0, %s723_s28  ;;  %s1040_s7 = scalar_lea.hbm %s1537_s0, 512 }
  0x50   : > { %s1035_s5 = scalar_lea.hbm %s1348_s30, 256  ;;  %p1041_p13 = scmp.lt.u32.totalorder %s1348_s30, %s1537_s0 }
  0x51   : > { %p1036_p12 = scmp.ne.s32.totalorder %s1348_s30, %s1035_s5  ;;  %p1042_p6 = scmp.lt.u32.totalorder %s1040_s7, %s1035_s5 }
  0x52   : > { %p1044_p3 = scmp.lt.u32.totalorder %s1035_s5, %s1348_s30 }
  0x53   : > { %p1038_p1 = pnand %p1037_p0, %p1036_p12  ;;  %p1043_p10 = por %p1042_p6, %p1041_p13 }
  0x55   : > { %p1039_p2 = pneg %p1038_p1  ;;  %p1045_p7 = por %p1044_p3, %p1043_p10 }
  0x57   : > { %p1046_p9 = pnand %p1045_p7, %p1039_p2 }
  0x59   : > { %1049 = shalt.err (!%p1046_p9)
}
  0x5a   : > { %s1050_s20 = scalar_lea.vmem %s1350_s6, 256  ;;  %s1179_s11 = smov [#allocation2]  }
  0x5b   : > { %p1051_p12 = scmp.ne.s32.totalorder %s1350_s6, %s1050_s20  ;;  %s1055_s12 = sshll.u32 %s1179_s11, 4  ;;  %s1056_s12 = int_to_ptr.vmem [resolvable:$false] %s1055_s12 }
  0x5c   : > { %s1057_s24 = scalar_lea.vmem %s1056_s12, 512  ;;  %p1058_p4 = scmp.lt.s32.totalorder %s1350_s6, %s1056_s12 }
  0x5d   : > { %p1053_p1 = pnand %p1051_p12, %p1037_p0  ;;  %p1059_p13 = scmp.lt.s32.totalorder %s1057_s24, %s1050_s20 }
  0x5f   : > { %p1054_p5 = pneg %p1053_p1  ;;  %p1060_p6 = por %p1059_p13, %p1058_p4 }
  0x61   : > { %p1061_p10 = pnand %p1060_p6, %p1054_p5 }
  0x63   : > { %1064 = shalt.err (!%p1061_p10)
}
  0x64   : > { %s1539_s10 = smov 8   ;;  %s1540_s5 = smov 128  }
  0x65   : > { %927 = dma.hbm_to_vmem [thread:$0]  (!%p1352_p11), %s1348_s30, 256, %s1350_s6, %s1363_s29, %s1540_s5, %s1540_s5, %s1539_s10  }
  0x66   : > { %s209_s7 = sand.u32 1, %s1173_s18   ;;  %s1065_s28 = scalar_lea.hbm %s1359_s9, 256 }
  0x67   : > { %s1398_s8 = scalar_lea.sflag [#allocation6], %s209_s7  ;;  %p1066_p4 = scmp.ne.s32.totalorder %s1359_s9, %s1065_s28 }
  0x68   : > { %s1070_s12 = scalar_lea.hbm %s1519_s1, 512  ;;  %p1071_p3 = scmp.lt.u32.totalorder %s1359_s9, %s1519_s1 }
  0x69   : > { %p1068_p5 = pnand %p1066_p4, %p1037_p0  ;;  %p1072_p7 = scmp.lt.u32.totalorder %s1070_s12, %s1065_s28 }
  0x6a   : > { %p1074_p12 = scmp.lt.u32.totalorder %s1065_s28, %s1359_s9 }
  0x6b   : > { %p1069_p2 = pneg %p1068_p5  ;;  %p1073_p9 = por %p1072_p7, %p1071_p3 }
  0x6d   : > { %p1075_p1 = por %p1074_p12, %p1073_p9 }
  0x6f   : > { %p1076_p13 = pnand %p1075_p1, %p1069_p2 }
  0x71   : > { %1079 = shalt.err (!%p1076_p13)
}
  0x72   : > { %s1080_s30 = scalar_lea.vmem %s1395_s27, 256  ;;  %s1180_s6 = smov [#allocation5]  }
  0x73   : > { %p1081_p6 = scmp.ne.s32.totalorder %s1395_s27, %s1080_s30  ;;  %s1085_s29 = sshll.u32 %s1180_s6, 4  ;;  %s1086_s29 = int_to_ptr.vmem [resolvable:$false] %s1085_s29 }
  0x74   : > { %s1087_s0 = scalar_lea.vmem %s1086_s29, 512  ;;  %p1088_p5 = scmp.lt.s32.totalorder %s1395_s27, %s1086_s29 }
  0x75   : > { %p1083_p10 = pnand %p1081_p6, %p1037_p0  ;;  %p1089_p3 = scmp.lt.s32.totalorder %s1087_s0, %s1080_s30 }
  0x77   : > { %p1084_p4 = pneg %p1083_p10  ;;  %p1090_p7 = por %p1089_p3, %p1088_p5 }
  0x79   : > { %p1091_p9 = pnand %p1090_p7, %p1084_p4 }
  0x7b   : > { %1094 = shalt.err (!%p1091_p9)
}
  0x7c   : > { %930 = dma.hbm_to_vmem [thread:$0]  (!%p1352_p11), %s1359_s9, 256, %s1395_s27, %s1398_s8, %s1540_s5, %s1540_s5, %s1539_s10  }
  0x7d   : > { %232 = sbr.rel (%p1249_p8) target bundleno = 623 (0x26f), region = 36  ;;  %s1430_s7 = sand.u32 (!%p1249_p8), 1, %s1165_s16  }
  0x7e   : > { %s1433_s28 = sshll.u32 (!%p1249_p8), %s1430_s7, 4  ;;  %s235_s25 = scalar_lea.sflag (!%p1249_p8), [#allocation3], %s1430_s7 }
  0x7f   : > { %s238_s20 = scalar_lea.vmem (!%p1249_p8), [#allocation2], %s1433_s28  ;;  %p1541_p0 = scmp.ne.s32.totalorder (!%p1249_p8), %s1531_s21, 0 }
  0x84   : > { %1140 = dma.done.wait (%p1541_p0), %s235_s25, 256  }
  0x85   : > { %1142 = vsyncadd (%p1541_p0), %s235_s25, 4294967040  ;;  %s243_s23 = sand.u32 1, %s1230_s19   ;;  %s247_s27 = scalar_lea.vmem [#allocation5], %s1433_s28 }
  0x86   : > { %s244_s9 = scalar_lea.sflag [#allocation6], %s243_s23 }
  0x87   : > { %1144 = dma.done.wait (%p1541_p0), %s244_s9, 256  }
  0x88   : > { %1146 = vsyncadd (%p1541_p0), %s244_s9, 4294967040  ;;  %p1542_p8 = scmp.eq.s32.totalorder %s1230_s19, 0 }
  0x8a   : > { %1148 = dma.done.wait (%p1542_p8), [#allocation6], 2048   ;;  %p1543_p11 = pmov %p1542_p8 }
  0x8b   : > { %p1544_p2 = pmov %p1542_p8 }
  0x8c   : > { %1150 = vsyncadd (%p1543_p11), [#allocation6], 4294965248 }
  0x8d   : > { %1152 = dma.done.wait (%p1544_p2), [#allocation9], 2048   ;;  %p1545_p12 = pmov %p1544_p2 }
  0x8e   : > { %v300_v0 = vld [vmem:[#allocation7 + $0x40] sm:$0xff]  ;;  %v301_v1 = vld [vmem:[#allocation7 + $0x48] sm:$0xff]  ;;  %v302_v2 = vld [vmem:[#allocation7 + $0x50] sm:$0xff]  ;;  %vm308_vm0 = vcmask 523264   ;;  %s284_s21 = scalar_lea.vmem [#allocation10], %s1433_s28  ;;  %s725_s5 = sshll.u32 %s1230_s19, 8 }
  0x8f   : > { %1154 = vsyncadd (%p1545_p12), [#allocation9], 4294965248  ;;  %v837_v3 = vpack.c.bf16 %v301_v1, %v300_v0  ;;  %v303_v4 = vld [vmem:[#allocation7 + $0x58] sm:$0xff]  ;;  %v304_v6 = vld [vmem:[#allocation7 + $0x60] sm:$0xff]  ;;  %s582_s10 = sshll.u32 %s284_s21, 4  ;;  %s1474_s12 = scalar_lea.hbm %s1522_s4, %s725_s5  ;;  %s1469_s10 = int_to_ptr.vmem [resolvable:$true] %s582_s10 }
  0x90   : > { %v841_v5 = vpack.c.bf16 %v303_v4, %v302_v2  ;;  %v305_v7 = vld [vmem:[#allocation7 + $0x68] sm:$0xff]  ;;  %v298_v8 = vld [vmem:[%s247_s27] sm:$0xff]  ;;  %v307_v11 = vld [vmem:[#allocation7 + $0x78] sm:$0xff]  ;;  %s569_s24 = scalar_lea.sflag [#allocation4], %s1430_s7  ;;  %s1095_s30 = scalar_lea.vmem %s1469_s10, 256 }
  0x91   : > { %838 = vmatprep.subr.bf16.mxu0 %v837_v3  ;;  %780 = vmatprep.mubr.msk.f32.mxu0 %vm308_vm0, %v298_v8  ;;  %v845_v9 = vpack.c.bf16 %v305_v7, %v304_v6  ;;  %v306_v10 = vld [vmem:[#allocation7 + $0x70] sm:$0xff]  ;;  %v473_v12 = vld [vmem:[#allocation8] sm:$0xff]  ;;  %v474_v13 = vld [vmem:[#allocation8 + $0x8] sm:$0xff]  ;;  %p1096_p1 = scmp.ne.s32.totalorder %s1469_s10, %s1095_s30  ;;  %p1546_p13 = scmp.ne.s32.totalorder %s1536_s13, 0 }
  0x92   : > { %840 = vmatpush3.bf16.msra.mxu0 %v837_v3  ;;  %v475_v14 = vld [vmem:[#allocation8 + $0x10] sm:$0xff]  ;;  %v476_v15 = vld [vmem:[#allocation8 + $0x18] sm:$0xff]  ;;  %v869_v16 = vpack.c.bf16 %v474_v13, %v473_v12  ;;  %v849_v18 = vpack.c.bf16 %v307_v11, %v306_v10  ;;  %v477_v19 = vld [vmem:[#allocation8 + $0x20] sm:$0xff]  ;;  %s1181_s19 = smov [#allocation10]  }
  0x93   : > { %842 = vmatprep.subr.bf16.mxu0 %v841_v5  ;;  %v873_v17 = vpack.c.bf16 %v476_v15, %v475_v14  ;;  %v478_v20 = vld [vmem:[#allocation8 + $0x28] sm:$0xff]  ;;  %v290_v21 = vld [vmem:[#allocation7] sm:$0xff]  ;;  %v292_v25 = vld [vmem:[#allocation7 + $0x10] sm:$0xff]  ;;  %p1097_p6 = pnand %p1096_p1, %p1546_p13  ;;  %s1099_s6 = sshll.u32 %s1181_s19, 4  ;;  %s1100_s6 = int_to_ptr.vmem [resolvable:$false] %s1099_s6 }
  0x94   : > { %v291_v22 = vld [vmem:[#allocation7 + $0x8] sm:$0xff]  ;;  %870 = vmatprep.subr.bf16.mxu1 %v869_v16  ;;  %v877_v23 = vpack.c.bf16 %v478_v20, %v477_v19  ;;  %v293_v26 = vld [vmem:[#allocation7 + $0x18] sm:$0xff]  ;;  %v479_v27 = vld [vmem:[#allocation8 + $0x30] sm:$0xff]  ;;  %s1101_s29 = scalar_lea.vmem %s1100_s6, 512  ;;  %p1102_p4 = scmp.lt.s32.totalorder %s1469_s10, %s1100_s6 }
  0x95   : > { %872 = vmatpush3.bf16.msra.mxu1 %v869_v16  ;;  %v853_v24 = vpack.c.bf16 %v291_v22, %v290_v21  ;;  %v480_v28 = vld [vmem:[#allocation8 + $0x38] sm:$0xff]  ;;  %v857_v30 = vpack.c.bf16 %v293_v26, %v292_v25  ;;  %v288_v31 = vld [vmem:[%s238_s20] sm:$0xff]  ;;  %v482_v34 = vld [vmem:[#allocation8 + $0x48] sm:$0xff]  ;;  %p1098_p10 = pneg %p1097_p6  ;;  %p1103_p5 = scmp.lt.s32.totalorder %s1101_s29, %s1095_s30 }
  0x96   : > { %844 = vmatpush3.bf16.msra.mxu0 %v841_v5  ;;  %874 = vmatprep.subr.bf16.mxu1 %v873_v17  ;;  %v299_v29 = vld [vmem:[%s247_s27 + $0x8] sm:$0xff]  ;;  %v881_v32 = vpack.c.bf16 %v480_v28, %v479_v27  ;;  %v481_v33 = vld [vmem:[#allocation8 + $0x40] sm:$0xff]  ;;  %v483_v39 = vld [vmem:[#allocation8 + $0x50] sm:$0xff] }
  0x97   : > { %846 = vmatprep.subr.bf16.mxu0 %v845_v9  ;;  %v294_v35 = vld [vmem:[#allocation7 + $0x20] sm:$0xff]  ;;  %v295_v36 = vld [vmem:[#allocation7 + $0x28] sm:$0xff]  ;;  %v885_v37 = vpack.c.bf16 %v482_v34, %v481_v33  ;;  %v484_v40 = vld [vmem:[#allocation8 + $0x58] sm:$0xff]  ;;  %p1104_p3 = por %p1103_p5, %p1102_p4 }
  0x98   : > { %v861_v38 = vpack.c.bf16 %v295_v36, %v294_v35  ;;  %v296_v41 = vld [vmem:[#allocation7 + $0x30] sm:$0xff]  ;;  %v297_v42 = vld [vmem:[#allocation7 + $0x38] sm:$0xff]  ;;  %v889_v43 = vpack.c.bf16 %v484_v40, %v483_v39  ;;  %v485_v45 = vld [vmem:[#allocation8 + $0x60] sm:$0xff] }
  0x99   : > { %876 = vmatpush3.bf16.msra.mxu1 %v873_v17  ;;  %v865_v44 = vpack.c.bf16 %v297_v42, %v296_v41  ;;  %v486_v46 = vld [vmem:[#allocation8 + $0x68] sm:$0xff]  ;;  %v487_v49 = vld [vmem:[#allocation8 + $0x70] sm:$0xff]  ;;  %v488_v50 = vld [vmem:[#allocation8 + $0x78] sm:$0xff]  ;;  %p1105_p7 = pnand %p1104_p3, %p1098_p10 }
  0x9a   : > { %848 = vmatpush3.bf16.msra.mxu0 %v845_v9  ;;  %878 = vmatprep.subr.bf16.mxu1 %v877_v23  ;;  %v893_v47 = vpack.c.bf16 %v486_v46, %v485_v45  ;;  %v289_v48 = vld [vmem:[%s238_s20 + $0x8] sm:$0xff]  ;;  %v897_v51 = vpack.c.bf16 %v488_v50, %v487_v49 }
  0x9b   : > { %850 = vmatprep.subr.bf16.mxu0 %v849_v18 }
  0x9d   : > { %880 = vmatpush3.bf16.msra.mxu1 %v877_v23 }
  0x9e   : > { %852 = vmatpush3.bf16.msra.mxu0 %v849_v18  ;;  %882 = vmatprep.subr.bf16.mxu1 %v881_v32 }
  0x9f   : > { %854 = vmatprep.subr.bf16.mxu0 %v853_v24 }
  0xa1   : > { %781 = vmatmul.mubr.msk.f32.vlgmr.msra.gmra.mrb[0].mxu0 %vm308_vm0, %v299_v29  ;;  %884 = vmatpush3.bf16.msra.mxu1 %v881_v32 }
  0xa2   : > { %856 = vmatpush3.bf16.msra.mxu0 %v853_v24  ;;  %799 = vmatprep.mubr.msk.f32.mxu0 %vm308_vm0, %v288_v31 }
  0xa3   : > { %858 = vmatprep.subr.bf16.mxu0 %v857_v30  ;;  %886 = vmatprep.subr.bf16.mxu1 %v885_v37 }
  0xa5   : > { %888 = vmatpush3.bf16.msra.mxu1 %v885_v37 }
  0xa6   : > { %860 = vmatpush3.bf16.msra.mxu0 %v857_v30  ;;  %890 = vmatprep.subr.bf16.mxu1 %v889_v43 }
  0xa7   : > { %862 = vmatprep.subr.bf16.mxu0 %v861_v38 }
  0xa9   : > { %892 = vmatpush3.bf16.msra.mxu1 %v889_v43 }
  0xaa   : > { %864 = vmatpush3.bf16.msra.mxu0 %v861_v38  ;;  %894 = vmatprep.subr.bf16.mxu1 %v893_v47 }
  0xab   : > { %866 = vmatprep.subr.bf16.mxu0 %v865_v44 }
  0xad   : > { %896 = vmatpush3.bf16.msra.mxu1 %v893_v47 }
  0xae   : > { %868 = vmatpush3.bf16.msra.mxu0 %v865_v44  ;;  %898 = vmatprep.subr.bf16.mxu1 %v897_v51 }
  0xb1   : > { %800 = vmatmul.mubr.msk.f32.vlgmr.msra.gmra.mrb[0].mxu0 %vm308_vm0, %v289_v48  ;;  %900 = vmatpush3.bf16.msra.mxu1 %v897_v51 }
 0x184   : > { %v801_v52 = vpop.f32.mrb[0].mxu0 }
 0x185   : > { %v462_v53 = vpop.f32.mrb[1].mxu0  ;;  %v472_v55 = vmax.f32 %v801_v52, 0.0 }
 0x186   : > { %v471_v54 = vmax.f32 %v462_v53, 0.0 }
 0x188   : > { %834 = vmatprep.mubr.f32.mxu1 %v471_v54 }
 0x189   : > { %835 = vmatmul.mubr.f32.vlgmr.msra.gmra.mrb[0].mxu1 %v472_v55 }
 0x25c   : > { %v836_v56 = vpop.f32.mrb[0].mxu1 }
 0x25d   : > { %v565_v57 = vmax.f32 %v836_v56, 0.0  ;;  %v555_v58 = vpop.f32.mrb[1].mxu1 }
 0x25e   : > { %v564_v59 = vmax.f32 %v555_v58, 0.0 }
 0x25f   : > { %567 = vst [vmem:[%s284_s21 + $0x8] sm:$0xff] %v565_v57 }
 0x260   : > { %566 = vst [vmem:[%s284_s21] sm:$0xff] %v564_v59 }
 0x261   : > { %1108 = shalt.err (!%p1105_p7)
}
 0x262   : > { %s1109_s0 = scalar_lea.hbm %s1474_s12, 256  ;;  %s1113_s20 = scalar_lea.hbm %s1522_s4, 512 }
 0x263   : > { %p1110_p9 = scmp.ne.s32.totalorder %s1474_s12, %s1109_s0  ;;  %p1114_p11 = scmp.lt.u32.totalorder %s1474_s12, %s1522_s4 }
 0x264   : > { %p1115_p2 = scmp.lt.u32.totalorder %s1113_s20, %s1109_s0  ;;  %p1117_p1 = scmp.lt.u32.totalorder %s1109_s0, %s1474_s12 }
 0x265   : > { %p1111_p0 = pnand %p1110_p9, %p1546_p13 }
 0x266   : > { %p1116_p12 = por %p1115_p2, %p1114_p11 }
 0x267   : > { %p1112_p8 = pneg %p1111_p0 }
 0x268   : > { %p1118_p6 = por %p1117_p1, %p1116_p12 }
 0x26a   : > { %p1119_p10 = pnand %p1118_p6, %p1112_p8 }
 0x26c   : > { %1122 = shalt.err (!%p1119_p10)
}
 0x26d   : > { %s1182_s27 = smov 128   ;;  %s1183_s21 = smov 8  }
 0x26e   : > { %915 = dma.vmem_to_hbm [thread:$0]  (%p1546_p13), %s1469_s10, 256, %s1474_s12, %s569_s24, %s1182_s27, %s1182_s27, %s1183_s21  }
 0x26f PF: > { %s597_s5 = sand.u32 1, %s1161_s15   ;;  %p1547_p4 = scmp.ne.s32.totalorder %s1532_s22, 0 }
 0x270   : > { %p1548_p5 = scmp.ge.s32.totalorder %s1173_s18, 2  ;;  %s598_s8 = scalar_lea.sflag [#allocation4], %s597_s5 }
 0x272   : > { %p932_p3 = pnand %p1548_p5, %p1547_p4 }
 0x274   : > { %1156 = dma.done.wait (!%p932_p3), %s598_s8, 256  }
 0x275   : > { %1158 = vsyncadd (!%p932_p3), %s598_s8, 4294967040  ;;  %p21_p7 = scmp.ge.s32.totalorder %s1325_s26, 4   ;;  %s1549_s15 = smov %s1165_s16 }
 0x276   : > { %s1550_s16 = smov %s1169_s17  ;;  %s1551_s17 = smov %s1341_s14 }
 0x277   : > { %s1552_s18 = smov %s1325_s26  ;;  %23 = sbr.rel (!%p21_p7) target bundleno = 10 (0xa), region = 102 }
 0x27e   :  { %603 = vsyncpa [#allocation3], 1 }
 0x27f   :  { %605 = vsyncpa [#allocation3 + $0x1], 1 }
 0x280   :  { %606 = vsyncpa [#allocation6], 1 }
 0x281   :  { %608 = vsyncpa [#allocation6 + $0x1], 1 }
 0x282   :  { %609 = vsyncpa [#allocation9], 1 }
 0x283   :  { %610 = vsyncpa [#allocation4], 1 }
 0x284   :  { %612 = vsyncpa [#allocation4 + $0x1], 1 }

// kernel: tpu_custom_call.1
= control target key start
LH: loop header
LB: loop body
LE: loop exit
PB: predicated region body
PF: predicated region fallthrough
CT: control target
= control target key end

     0   :  { %s1518_s0 = inlined_call_operand.hbm [shape: f32[32,64], index: 0, kind: input, shape index: {}]   ;;  %s1519_s1 = inlined_call_operand.hbm [shape: f32[32,64], index: 1, kind: input, shape index: {}]   ;;  %s1520_s2 = inlined_call_operand.hbm [shape: f32[128,128], index: 2, kind: input, shape index: {}]   ;;  %s1521_s3 = inlined_call_operand.hbm [shape: f32[128,128], index: 3, kind: input, shape index: {}]   ;;  %s1522_s4 = inlined_call_operand.hbm [shape: f32[32,128], index: 4, kind: output, shape index: {}]  }
   0x1   :  { %1530 = sst [smem:[#allocation16_spill]] %s1518_s0 }
   0x2   :  { %9 = vsyncpa [#allocation3], 0 }
   0x3   :  { %11 = vsyncpa [#allocation3 + $0x1], 0 }
   0x4   :  { %12 = vsyncpa [#allocation6], 0 }
   0x5   :  { %14 = vsyncpa [#allocation6 + $0x1], 0 }
   0x6   :  { %15 = vsyncpa [#allocation9], 0 }
   0x7   :  { %16 = vsyncpa [#allocation4], 0 }
   0x8   :  { %18 = vsyncpa [#allocation4 + $0x1], 0  ;;  %s1209_s15 = smov 0   ;;  %s1211_s16 = smov 0  }
   0x9   :  { %s1213_s17 = smov 0   ;;  %s1215_s18 = smov 0  }
   0xa LB: > { %s1230_s19 = sadd.s32 4294967295, %s1173_s18   ;;  %s697_s20 = sadd.s32 4294967294, %s1173_s18   ;;  %s1173_s18 = sphi %s1215_s18, %s1552_s18   ;;  %s1169_s17 = sphi %s1213_s17, %s1551_s17   ;;  %s1165_s16 = sphi %s1211_s16, %s1550_s16   ;;  %s1161_s15 = sphi %s1209_s15, %s1549_s15  }
   0xb   : > { %p44_p0 = scmp.ne.s32.totalorder %s1165_s16, %s1161_s15  ;;  %p1523_p1 = scmp.eq.s32.totalorder %s1230_s19, 0 }
   0xc   : > { %p142_p3 = scmp.eq.s32.totalorder %s697_s20, 1  ;;  %p698_p5 = scmp.ge.s32.totalorder %s1173_s18, 1 }
   0xd   : > { %p1239_p4 = por %p1523_p1, %p44_p0  ;;  %p149_p7 = scmp.lt.s32.totalorder %s1173_s18, 3 }
   0xe   : > { %p1244_p6 = por %p142_p3, %p44_p0  ;;  %s1175_s24 = smov [#allocation7]  }
   0xf   : > { %s1531_s21 = scalar_select %p1239_p4, 1, 0 }
  0x10   : > { %s1532_s22 = scalar_select %p1244_p6, 1, 0 }
  0x11   : > { %p1249_p8 = pnand %p698_p5, %p149_p7  ;;  %s161_s25 = sshll.u32 %s1175_s24, 4  ;;  %s1253_s25 = int_to_ptr.vmem [resolvable:$true] %s161_s25 }
  0x12   : > { %s1176_s27 = smov [#allocation8]   ;;  %s979_s5 = scalar_lea.hbm %s1520_s2, 2048 }
  0x13   : > { %p917_p9 = pneg %p1249_p8  ;;  %s174_s28 = sshll.u32 %s1176_s27, 4  ;;  %s1264_s28 = int_to_ptr.vmem [resolvable:$true] %s174_s28 }
  0x14   : > { %p980_p12 = scmp.ne.s32.totalorder %s1520_s2, %s979_s5  ;;  %p986_p5 = scmp.lt.u32.totalorder %s979_s5, %s1520_s2 }
  0x15   : > { %p1260_p11 = pnand %p917_p9, %p1523_p1 }
  0x17   : > { %p981_p13 = pneg %p1260_p11 }
  0x19   : > { %p982_p0 = pnand %p981_p13, %p980_p12 }
  0x1b   : > { %p983_p3 = pneg %p982_p0 }
  0x1d   : > { %p988_p7 = pnand %p986_p5, %p983_p3 }
  0x1f   : > { %991 = shalt.err (!%p988_p7)
}
  0x20   : > { %s992_s10 = scalar_lea.vmem %s1253_s25, 2048  ;;  %p1000_p2 = scmp.lt.s32.totalorder %s1253_s25, %s1253_s25 }
  0x21   : > { %p993_p9 = scmp.ne.s32.totalorder %s1253_s25, %s992_s10  ;;  %p1001_p12 = scmp.lt.s32.totalorder %s992_s10, %s992_s10 }
  0x23   : > { %p995_p10 = pnand %p993_p9, %p981_p13  ;;  %p1002_p0 = por %p1001_p12, %p1000_p2 }
  0x25   : > { %p996_p1 = pneg %p995_p10 }
  0x27   : > { %p1003_p6 = pnand %p1002_p0, %p996_p1 }
  0x29   : > { %1006 = shalt.err (!%p1003_p6)
}
  0x2a   : > { %s1524_s11 = smov 128   ;;  %s1526_s12 = smov 8  }
  0x2b   : > { %920 = dma.hbm_to_vmem [thread:$0]  (!%p1260_p11), %s1520_s2, 2048, %s1253_s25, [#allocation6], %s1524_s11, %s1524_s11, %s1526_s12  }
  0x2c   : > { %s1007_s27 = scalar_lea.hbm %s1521_s3, 2048 }
  0x2d   : > { %p1008_p1 = scmp.ne.s32.totalorder %s1521_s3, %s1007_s27  ;;  %p1014_p10 = scmp.lt.u32.totalorder %s1007_s27, %s1521_s3 }
  0x2f   : > { %p1010_p2 = pnand %p1008_p1, %p981_p13 }
  0x31   : > { %p1011_p6 = pneg %p1010_p2 }
  0x33   : > { %p1016_p3 = pnand %p1014_p10, %p1011_p6 }
  0x35   : > { %1019 = shalt.err (!%p1016_p3)
}
  0x36   : > { %s1020_s25 = scalar_lea.vmem %s1264_s28, 2048  ;;  %p1028_p12 = scmp.lt.s32.totalorder %s1264_s28, %s1264_s28 }
  0x37   : > { %p1021_p5 = scmp.ne.s32.totalorder %s1264_s28, %s1020_s25  ;;  %p1029_p0 = scmp.lt.s32.totalorder %s1020_s25, %s1020_s25 }
  0x39   : > { %p1023_p7 = pnand %p1021_p5, %p981_p13  ;;  %p1030_p1 = por %p1029_p0, %p1028_p12 }
  0x3b   : > { %p1024_p9 = pneg %p1023_p7 }
  0x3d   : > { %p1031_p2 = pnand %p1030_p1, %p1024_p9 }
  0x3f   : > { %1034 = shalt.err (!%p1031_p2)
}
  0x40   : > { %923 = dma.hbm_to_vmem [thread:$0]  (!%p1260_p11), %s1521_s3, 2048, %s1264_s28, [#allocation9], %s1524_s11, %s1524_s11, %s1526_s12  }
  0x41   : > { %s1325_s26 = sadd.s32 1, %s1173_s18   ;;  %s31_s9 = sadd.s32 1, %s1169_s17 }
  0x42   : > { %s28_s10 = ssub.s32 %s1173_s18, %s1325_s26  ;;  %p38_p13 = scmp.ne.s32.totalorder %s1169_s17, %s1165_s16 }
  0x43   : > { %p29_p6 = scmp.eq.s32.totalorder %s28_s10, 0  ;;  %p39_p10 = scmp.eq.s32.totalorder %s1173_s18, 0 }
  0x44   : > { %p1535_p3 = scmp.eq.s32.totalorder %s1230_s19, 1  ;;  %p937_p7 = scmp.lt.s32.totalorder %s1173_s18, 2 }
  0x45   : > { %s1341_s14 = scalar_select %p29_p6, %s1169_s17, %s31_s9  }
  0x46   : > { %p1335_p5 = por %p1535_p3, %p38_p13  ;;  %p40_p9 = por %p39_p10, %p38_p13 }
  0x47   : > { %s188_s20 = sand.u32 1, %s1169_s17   ;;  %s723_s28 = sshll.u32 %s1173_s18, 8 }
  0x48   : > { %s1536_s13 = scalar_select %p1335_p5, 1, 0 }
  0x49   : > { %s702_s24 = sshll.u32 %s188_s20, 4  ;;  %s1537_s0 = sld [smem:[#allocation16_spill]] }
  0x4a   : > { %s192_s5 = scalar_lea.vmem [#allocation2], %s702_s24  ;;  %p1352_p11 = pnand %p937_p7, %p40_p9 }
  0x4b   : > { %s199_s6 = sshll.u32 %s192_s5, 4  ;;  %s1359_s9 = scalar_lea.hbm %s1519_s1, %s723_s28  ;;  %s1350_s6 = int_to_ptr.vmem [resolvable:$true] %s199_s6 }
  0x4c   : > { %s213_s10 = scalar_lea.vmem [#allocation5], %s702_s24  ;;  %s1363_s29 = scalar_lea.sflag [#allocation3], %s188_s20 }
  0x4d   : > { %s1361_s27 = sshll.u32 %s213_s10, 4  ;;  %p1037_p0 = pneg %p1352_p11  ;;  %s1395_s27 = int_to_ptr.vmem [resolvable:$true] %s1361_s27 }
  0x4f   : > { %s1348_s30 = scalar_lea.hbm %s1537_s0, %s723_s28  ;;  %s1040_s7 = scalar_lea.hbm %s1537_s0, 512 }
  0x50   : > { %s1035_s5 = scalar_lea.hbm %s1348_s30, 256  ;;  %p1041_p13 = scmp.lt.u32.totalorder %s1348_s30, %s1537_s0 }
  0x51   : > { %p1036_p12 = scmp.ne.s32.totalorder %s1348_s30, %s1035_s5  ;;  %p1042_p6 = scmp.lt.u32.totalorder %s1040_s7, %s1035_s5 }
  0x52   : > { %p1044_p3 = scmp.lt.u32.totalorder %s1035_s5, %s1348_s30 }
  0x53   : > { %p1038_p1 = pnand %p1037_p0, %p1036_p12  ;;  %p1043_p10 = por %p1042_p6, %p1041_p13 }
  0x55   : > { %p1039_p2 = pneg %p1038_p1  ;;  %p1045_p7 = por %p1044_p3, %p1043_p10 }
  0x57   : > { %p1046_p9 = pnand %p1045_p7, %p1039_p2 }
  0x59   : > { %1049 = shalt.err (!%p1046_p9)
}
  0x5a   : > { %s1050_s20 = scalar_lea.vmem %s1350_s6, 256  ;;  %s1179_s11 = smov [#allocation2]  }
  0x5b   : > { %p1051_p12 = scmp.ne.s32.totalorder %s1350_s6, %s1050_s20  ;;  %s1055_s12 = sshll.u32 %s1179_s11, 4  ;;  %s1056_s12 = int_to_ptr.vmem [resolvable:$false] %s1055_s12 }
  0x5c   : > { %s1057_s24 = scalar_lea.vmem %s1056_s12, 512  ;;  %p1058_p4 = scmp.lt.s32.totalorder %s1350_s6, %s1056_s12 }
  0x5d   : > { %p1053_p1 = pnand %p1051_p12, %p1037_p0  ;;  %p1059_p13 = scmp.lt.s32.totalorder %s1057_s24, %s1050_s20 }
  0x5f   : > { %p1054_p5 = pneg %p1053_p1  ;;  %p1060_p6 = por %p1059_p13, %p1058_p4 }
  0x61   : > { %p1061_p10 = pnand %p1060_p6, %p1054_p5 }
  0x63   : > { %1064 = shalt.err (!%p1061_p10)
}
  0x64   : > { %s1539_s10 = smov 8   ;;  %s1540_s5 = smov 128  }
  0x65   : > { %927 = dma.hbm_to_vmem [thread:$0]  (!%p1352_p11), %s1348_s30, 256, %s1350_s6, %s1363_s29, %s1540_s5, %s1540_s5, %s1539_s10  }
  0x66   : > { %s209_s7 = sand.u32 1, %s1173_s18   ;;  %s1065_s28 = scalar_lea.hbm %s1359_s9, 256 }
  0x67   : > { %s1398_s8 = scalar_lea.sflag [#allocation6], %s209_s7  ;;  %p1066_p4 = scmp.ne.s32.totalorder %s1359_s9, %s1065_s28 }
  0x68   : > { %s1070_s12 = scalar_lea.hbm %s1519_s1, 512  ;;  %p1071_p3 = scmp.lt.u32.totalorder %s1359_s9, %s1519_s1 }
  0x69   : > { %p1068_p5 = pnand %p1066_p4, %p1037_p0  ;;  %p1072_p7 = scmp.lt.u32.totalorder %s1070_s12, %s1065_s28 }
  0x6a   : > { %p1074_p12 = scmp.lt.u32.totalorder %s1065_s28, %s1359_s9 }
  0x6b   : > { %p1069_p2 = pneg %p1068_p5  ;;  %p1073_p9 = por %p1072_p7, %p1071_p3 }
  0x6d   : > { %p1075_p1 = por %p1074_p12, %p1073_p9 }
  0x6f   : > { %p1076_p13 = pnand %p1075_p1, %p1069_p2 }
  0x71   : > { %1079 = shalt.err (!%p1076_p13)
}
  0x72   : > { %s1080_s30 = scalar_lea.vmem %s1395_s27, 256  ;;  %s1180_s6 = smov [#allocation5]  }
  0x73   : > { %p1081_p6 = scmp.ne.s32.totalorder %s1395_s27, %s1080_s30  ;;  %s1085_s29 = sshll.u32 %s1180_s6, 4  ;;  %s1086_s29 = int_to_ptr.vmem [resolvable:$false] %s1085_s29 }
  0x74   : > { %s1087_s0 = scalar_lea.vmem %s1086_s29, 512  ;;  %p1088_p5 = scmp.lt.s32.totalorder %s1395_s27, %s1086_s29 }
  0x75   : > { %p1083_p10 = pnand %p1081_p6, %p1037_p0  ;;  %p1089_p3 = scmp.lt.s32.totalorder %s1087_s0, %s1080_s30 }
  0x77   : > { %p1084_p4 = pneg %p1083_p10  ;;  %p1090_p7 = por %p1089_p3, %p1088_p5 }
  0x79   : > { %p1091_p9 = pnand %p1090_p7, %p1084_p4 }
  0x7b   : > { %1094 = shalt.err (!%p1091_p9)
}
  0x7c   : > { %930 = dma.hbm_to_vmem [thread:$0]  (!%p1352_p11), %s1359_s9, 256, %s1395_s27, %s1398_s8, %s1540_s5, %s1540_s5, %s1539_s10  }
  0x7d   : > { %232 = sbr.rel (%p1249_p8) target bundleno = 623 (0x26f), region = 36  ;;  %s1430_s7 = sand.u32 (!%p1249_p8), 1, %s1165_s16  }
  0x7e   : > { %s1433_s28 = sshll.u32 (!%p1249_p8), %s1430_s7, 4  ;;  %s235_s25 = scalar_lea.sflag (!%p1249_p8), [#allocation3], %s1430_s7 }
  0x7f   : > { %s238_s20 = scalar_lea.vmem (!%p1249_p8), [#allocation2], %s1433_s28  ;;  %p1541_p0 = scmp.ne.s32.totalorder (!%p1249_p8), %s1531_s21, 0 }
  0x84   : > { %1140 = dma.done.wait (%p1541_p0), %s235_s25, 256  }
  0x85   : > { %1142 = vsyncadd (%p1541_p0), %s235_s25, 4294967040  ;;  %s243_s23 = sand.u32 1, %s1230_s19   ;;  %s247_s27 = scalar_lea.vmem [#allocation5], %s1433_s28 }
  0x86   : > { %s244_s9 = scalar_lea.sflag [#allocation6], %s243_s23 }
  0x87   : > { %1144 = dma.done.wait (%p1541_p0), %s244_s9, 256  }
  0x88   : > { %1146 = vsyncadd (%p1541_p0), %s244_s9, 4294967040  ;;  %p1542_p8 = scmp.eq.s32.totalorder %s1230_s19, 0 }
  0x8a   : > { %1148 = dma.done.wait (%p1542_p8), [#allocation6], 2048   ;;  %p1543_p11 = pmov %p1542_p8 }
  0x8b   : > { %p1544_p2 = pmov %p1542_p8 }
  0x8c   : > { %1150 = vsyncadd (%p1543_p11), [#allocation6], 4294965248 }
  0x8d   : > { %1152 = dma.done.wait (%p1544_p2), [#allocation9], 2048   ;;  %p1545_p12 = pmov %p1544_p2 }
  0x8e   : > { %v300_v0 = vld [vmem:[#allocation7 + $0x40] sm:$0xff]  ;;  %v301_v1 = vld [vmem:[#allocation7 + $0x48] sm:$0xff]  ;;  %v302_v2 = vld [vmem:[#allocation7 + $0x50] sm:$0xff]  ;;  %vm308_vm0 = vcmask 523264   ;;  %s284_s21 = scalar_lea.vmem [#allocation10], %s1433_s28  ;;  %s725_s5 = sshll.u32 %s1230_s19, 8 }
  0x8f   : > { %1154 = vsyncadd (%p1545_p12), [#allocation9], 4294965248  ;;  %v837_v3 = vpack.c.bf16 %v301_v1, %v300_v0  ;;  %v303_v4 = vld [vmem:[#allocation7 + $0x58] sm:$0xff]  ;;  %v304_v6 = vld [vmem:[#allocation7 + $0x60] sm:$0xff]  ;;  %s582_s10 = sshll.u32 %s284_s21, 4  ;;  %s1474_s12 = scalar_lea.hbm %s1522_s4, %s725_s5  ;;  %s1469_s10 = int_to_ptr.vmem [resolvable:$true] %s582_s10 }
  0x90   : > { %v841_v5 = vpack.c.bf16 %v303_v4, %v302_v2  ;;  %v305_v7 = vld [vmem:[#allocation7 + $0x68] sm:$0xff]  ;;  %v298_v8 = vld [vmem:[%s247_s27] sm:$0xff]  ;;  %v307_v11 = vld [vmem:[#allocation7 + $0x78] sm:$0xff]  ;;  %s569_s24 = scalar_lea.sflag [#allocation4], %s1430_s7  ;;  %s1095_s30 = scalar_lea.vmem %s1469_s10, 256 }
  0x91   : > { %838 = vmatprep.subr.bf16.mxu0 %v837_v3  ;;  %780 = vmatprep.mubr.msk.f32.mxu0 %vm308_vm0, %v298_v8  ;;  %v845_v9 = vpack.c.bf16 %v305_v7, %v304_v6  ;;  %v306_v10 = vld [vmem:[#allocation7 + $0x70] sm:$0xff]  ;;  %v473_v12 = vld [vmem:[#allocation8] sm:$0xff]  ;;  %v474_v13 = vld [vmem:[#allocation8 + $0x8] sm:$0xff]  ;;  %p1096_p1 = scmp.ne.s32.totalorder %s1469_s10, %s1095_s30  ;;  %p1546_p13 = scmp.ne.s32.totalorder %s1536_s13, 0 }
  0x92   : > { %840 = vmatpush3.bf16.msra.mxu0 %v837_v3  ;;  %v475_v14 = vld [vmem:[#allocation8 + $0x10] sm:$0xff]  ;;  %v476_v15 = vld [vmem:[#allocation8 + $0x18] sm:$0xff]  ;;  %v869_v16 = vpack.c.bf16 %v474_v13, %v473_v12  ;;  %v849_v18 = vpack.c.bf16 %v307_v11, %v306_v10  ;;  %v477_v19 = vld [vmem:[#allocation8 + $0x20] sm:$0xff]  ;;  %s1181_s19 = smov [#allocation10]  }
  0x93   : > { %842 = vmatprep.subr.bf16.mxu0 %v841_v5  ;;  %v873_v17 = vpack.c.bf16 %v476_v15, %v475_v14  ;;  %v478_v20 = vld [vmem:[#allocation8 + $0x28] sm:$0xff]  ;;  %v290_v21 = vld [vmem:[#allocation7] sm:$0xff]  ;;  %v292_v25 = vld [vmem:[#allocation7 + $0x10] sm:$0xff]  ;;  %p1097_p6 = pnand %p1096_p1, %p1546_p13  ;;  %s1099_s6 = sshll.u32 %s1181_s19, 4  ;;  %s1100_s6 = int_to_ptr.vmem [resolvable:$false] %s1099_s6 }
  0x94   : > { %v291_v22 = vld [vmem:[#allocation7 + $0x8] sm:$0xff]  ;;  %870 = vmatprep.subr.bf16.mxu1 %v869_v16  ;;  %v877_v23 = vpack.c.bf16 %v478_v20, %v477_v19  ;;  %v293_v26 = vld [vmem:[#allocation7 + $0x18] sm:$0xff]  ;;  %v479_v27 = vld [vmem:[#allocation8 + $0x30] sm:$0xff]  ;;  %s1101_s29 = scalar_lea.vmem %s1100_s6, 512  ;;  %p1102_p4 = scmp.lt.s32.totalorder %s1469_s10, %s1100_s6 }
  0x95   : > { %872 = vmatpush3.bf16.msra.mxu1 %v869_v16  ;;  %v853_v24 = vpack.c.bf16 %v291_v22, %v290_v21  ;;  %v480_v28 = vld [vmem:[#allocation8 + $0x38] sm:$0xff]  ;;  %v857_v30 = vpack.c.bf16 %v293_v26, %v292_v25  ;;  %v288_v31 = vld [vmem:[%s238_s20] sm:$0xff]  ;;  %v482_v34 = vld [vmem:[#allocation8 + $0x48] sm:$0xff]  ;;  %p1098_p10 = pneg %p1097_p6  ;;  %p1103_p5 = scmp.lt.s32.totalorder %s1101_s29, %s1095_s30 }
  0x96   : > { %844 = vmatpush3.bf16.msra.mxu0 %v841_v5  ;;  %874 = vmatprep.subr.bf16.mxu1 %v873_v17  ;;  %v299_v29 = vld [vmem:[%s247_s27 + $0x8] sm:$0xff]  ;;  %v881_v32 = vpack.c.bf16 %v480_v28, %v479_v27  ;;  %v481_v33 = vld [vmem:[#allocation8 + $0x40] sm:$0xff]  ;;  %v483_v39 = vld [vmem:[#allocation8 + $0x50] sm:$0xff] }
  0x97   : > { %846 = vmatprep.subr.bf16.mxu0 %v845_v9  ;;  %v294_v35 = vld [vmem:[#allocation7 + $0x20] sm:$0xff]  ;;  %v295_v36 = vld [vmem:[#allocation7 + $0x28] sm:$0xff]  ;;  %v885_v37 = vpack.c.bf16 %v482_v34, %v481_v33  ;;  %v484_v40 = vld [vmem:[#allocation8 + $0x58] sm:$0xff]  ;;  %p1104_p3 = por %p1103_p5, %p1102_p4 }
  0x98   : > { %v861_v38 = vpack.c.bf16 %v295_v36, %v294_v35  ;;  %v296_v41 = vld [vmem:[#allocation7 + $0x30] sm:$0xff]  ;;  %v297_v42 = vld [vmem:[#allocation7 + $0x38] sm:$0xff]  ;;  %v889_v43 = vpack.c.bf16 %v484_v40, %v483_v39  ;;  %v485_v45 = vld [vmem:[#allocation8 + $0x60] sm:$0xff] }
  0x99   : > { %876 = vmatpush3.bf16.msra.mxu1 %v873_v17  ;;  %v865_v44 = vpack.c.bf16 %v297_v42, %v296_v41  ;;  %v486_v46 = vld [vmem:[#allocation8 + $0x68] sm:$0xff]  ;;  %v487_v49 = vld [vmem:[#allocation8 + $0x70] sm:$0xff]  ;;  %v488_v50 = vld [vmem:[#allocation8 + $0x78] sm:$0xff]  ;;  %p1105_p7 = pnand %p1104_p3, %p1098_p10 }
  0x9a   : > { %848 = vmatpush3.bf16.msra.mxu0 %v845_v9  ;;  %878 = vmatprep.subr.bf16.mxu1 %v877_v23  ;;  %v893_v47 = vpack.c.bf16 %v486_v46, %v485_v45  ;;  %v289_v48 = vld [vmem:[%s238_s20 + $0x8] sm:$0xff]  ;;  %v897_v51 = vpack.c.bf16 %v488_v50, %v487_v49 }
  0x9b   : > { %850 = vmatprep.subr.bf16.mxu0 %v849_v18 }
  0x9d   : > { %880 = vmatpush3.bf16.msra.mxu1 %v877_v23 }
  0x9e   : > { %852 = vmatpush3.bf16.msra.mxu0 %v849_v18  ;;  %882 = vmatprep.subr.bf16.mxu1 %v881_v32 }
  0x9f   : > { %854 = vmatprep.subr.bf16.mxu0 %v853_v24 }
  0xa1   : > { %781 = vmatmul.mubr.msk.f32.vlgmr.msra.gmra.mrb[0].mxu0 %vm308_vm0, %v299_v29  ;;  %884 = vmatpush3.bf16.msra.mxu1 %v881_v32 }
  0xa2   : > { %856 = vmatpush3.bf16.msra.mxu0 %v853_v24  ;;  %799 = vmatprep.mubr.msk.f32.mxu0 %vm308_vm0, %v288_v31 }
  0xa3   : > { %858 = vmatprep.subr.bf16.mxu0 %v857_v30  ;;  %886 = vmatprep.subr.bf16.mxu1 %v885_v37 }
  0xa5   : > { %888 = vmatpush3.bf16.msra.mxu1 %v885_v37 }
  0xa6   : > { %860 = vmatpush3.bf16.msra.mxu0 %v857_v30  ;;  %890 = vmatprep.subr.bf16.mxu1 %v889_v43 }
  0xa7   : > { %862 = vmatprep.subr.bf16.mxu0 %v861_v38 }
  0xa9   : > { %892 = vmatpush3.bf16.msra.mxu1 %v889_v43 }
  0xaa   : > { %864 = vmatpush3.bf16.msra.mxu0 %v861_v38  ;;  %894 = vmatprep.subr.bf16.mxu1 %v893_v47 }
  0xab   : > { %866 = vmatprep.subr.bf16.mxu0 %v865_v44 }
  0xad   : > { %896 = vmatpush3.bf16.msra.mxu1 %v893_v47 }
  0xae   : > { %868 = vmatpush3.bf16.msra.mxu0 %v865_v44  ;;  %898 = vmatprep.subr.bf16.mxu1 %v897_v51 }
  0xb1   : > { %800 = vmatmul.mubr.msk.f32.vlgmr.msra.gmra.mrb[0].mxu0 %vm308_vm0, %v289_v48  ;;  %900 = vmatpush3.bf16.msra.mxu1 %v897_v51 }
 0x184   : > { %v801_v52 = vpop.f32.mrb[0].mxu0 }
 0x185   : > { %v462_v53 = vpop.f32.mrb[1].mxu0  ;;  %v472_v55 = vmax.f32 %v801_v52, 0.0 }
 0x186   : > { %v471_v54 = vmax.f32 %v462_v53, 0.0 }
 0x188   : > { %834 = vmatprep.mubr.f32.mxu1 %v471_v54 }
 0x189   : > { %835 = vmatmul.mubr.f32.vlgmr.msra.gmra.mrb[0].mxu1 %v472_v55 }
 0x25c   : > { %v836_v56 = vpop.f32.mrb[0].mxu1 }
 0x25d   : > { %v565_v57 = vmax.f32 %v836_v56, 0.0  ;;  %v555_v58 = vpop.f32.mrb[1].mxu1 }
 0x25e   : > { %v564_v59 = vmax.f32 %v555_v58, 0.0 }
 0x25f   : > { %567 = vst [vmem:[%s284_s21 + $0x8] sm:$0xff] %v565_v57 }
 0x260   : > { %566 = vst [vmem:[%s284_s21] sm:$0xff] %v564_v59 }
 0x261   : > { %1108 = shalt.err (!%p1105_p7)
}
 0x262   : > { %s1109_s0 = scalar_lea.hbm %s1474_s12, 256  ;;  %s1113_s20 = scalar_lea.hbm %s1522_s4, 512 }
 0x263   : > { %p1110_p9 = scmp.ne.s32.totalorder %s1474_s12, %s1109_s0  ;;  %p1114_p11 = scmp.lt.u32.totalorder %s1474_s12, %s1522_s4 }
 0x264   : > { %p1115_p2 = scmp.lt.u32.totalorder %s1113_s20, %s1109_s0  ;;  %p1117_p1 = scmp.lt.u32.totalorder %s1109_s0, %s1474_s12 }
 0x265   : > { %p1111_p0 = pnand %p1110_p9, %p1546_p13 }
 0x266   : > { %p1116_p12 = por %p1115_p2, %p1114_p11 }
 0x267   : > { %p1112_p8 = pneg %p1111_p0 }
 0x268   : > { %p1118_p6 = por %p1117_p1, %p1116_p12 }
 0x26a   : > { %p1119_p10 = pnand %p1118_p6, %p1112_p8 }
 0x26c   : > { %1122 = shalt.err (!%p1119_p10)
}
 0x26d   : > { %s1182_s27 = smov 128   ;;  %s1183_s21 = smov 8  }
 0x26e   : > { %915 = dma.vmem_to_hbm [thread:$0]  (%p1546_p13), %s1469_s10, 256, %s1474_s12, %s569_s24, %s1182_s27, %s1182_s27, %s1183_s21  }
 0x26f PF: > { %s597_s5 = sand.u32 1, %s1161_s15   ;;  %p1547_p4 = scmp.ne.s32.totalorder %s1532_s22, 0 }
 0x270   : > { %p1548_p5 = scmp.ge.s32.totalorder %s1173_s18, 2  ;;  %s598_s8 = scalar_lea.sflag [#allocation4], %s597_s5 }
 0x272   : > { %p932_p3 = pnand %p1548_p5, %p1547_p4 }
 0x274   : > { %1156 = dma.done.wait (!%p932_p3), %s598_s8, 256  }
 0x275   : > { %1158 = vsyncadd (!%p932_p3), %s598_s8, 4294967040  ;;  %p21_p7 = scmp.ge.s32.totalorder %s1325_s26, 4   ;;  %s1549_s15 = smov %s1165_s16 }
 0x276   : > { %s1550_s16 = smov %s1169_s17  ;;  %s1551_s17 = smov %s1341_s14 }
 0x277   : > { %s1552_s18 = smov %s1325_s26  ;;  %23 = sbr.rel (!%p21_p7) target bundleno = 10 (0xa), region = 102 }
 0x27e   :  { %603 = vsyncpa [#allocation3], 1 }
 0x27f   :  { %605 = vsyncpa [#allocation3 + $0x1], 1 }
 0x280   :  { %606 = vsyncpa [#allocation6], 1 }
 0x281   :  { %608 = vsyncpa [#allocation6 + $0x1], 1 }
 0x282   :  { %609 = vsyncpa [#allocation9], 1 }
 0x283   :  { %610 = vsyncpa [#allocation4], 1 }
 0x284   :  { %612 = vsyncpa [#allocation4 + $0x1], 1 }

</bundles_post_ra>
